<compile_context>
chip_gen: v5e
topology: v5e:2x2
jax: 0.10.0
libtpu: 0.0.40
codegen_flags: <defaults>
</compile_context>

<pallas_src>
import jax
import jax.numpy as jnp
from jax.experimental import pallas as pl
from jax.experimental.pallas import tpu as pltpu


def _round_up(x, m):
    return (x + m - 1) // m * m


def _affine_kernel(x_ref, g_ref, b_ref, o_ref):
    # x_ref/o_ref: (TM, D) row tile; g_ref/b_ref: (1, D), resident across the grid.
    # Pure VPU elementwise with a sublane broadcast of the (1, D) parameter rows.
    o_ref[...] = x_ref[...] * g_ref[...] + b_ref[...]


def affine(x, g, b, *, target_block_bytes=2 * 1024 * 1024):
    """ResMLP Affine forward: x * g + b.

    x: (..., D)   (e.g. (B, N, D) batch, seq, feature)
    g, b: any shape reshapeable to (1, D) (e.g. (1, 1, D) like the PyTorch module)
    """
    orig_shape = x.shape
    D = orig_shape[-1]
    M = x.size // D
    itemsize = jnp.dtype(x.dtype).itemsize

    x2 = x.reshape(M, D)
    g2 = g.reshape(1, D).astype(x.dtype)
    b2 = b.reshape(1, D).astype(x.dtype)

    # Pick a row-tile height: ~target_block_bytes per block, multiple of 8 sublanes.
    rows = max(8, (target_block_bytes // max(1, D * itemsize)) // 8 * 8)
    tm = min(rows, _round_up(M, 8))

    # Pad the row count up to a multiple of the tile height (sliced off afterwards).
    m_pad = _round_up(M, tm)
    if m_pad != M:
        x2 = jnp.pad(x2, ((0, m_pad - M), (0, 0)))
    grid = (m_pad // tm,)

    # x block + out block, each double-buffered, plus resident g/b and headroom.
    block_bytes = tm * D * itemsize
    vmem_limit = int(4 * block_bytes + 4 * D * itemsize + (2 << 20))

    cost = pl.CostEstimate(
        flops=2 * M * D,
        transcendentals=0,
        bytes_accessed=2 * M * D * itemsize + 2 * D * itemsize,
    )

    # TODO(synk): if the caller can donate x, add input_output_aliases={0: 0} to avoid
    # allocating a second (M, D) HBM buffer (traffic is unchanged either way).
    out = pl.pallas_call(
        _affine_kernel,
        out_shape=jax.ShapeDtypeStruct((m_pad, D), x.dtype),
        grid_spec=pltpu.PrefetchScalarGridSpec(
            num_scalar_prefetch=0,
            grid=grid,
            in_specs=[
                pl.BlockSpec((tm, D), lambda i: (i, 0)),   # x: streamed row tiles
                pl.BlockSpec((1, D), lambda i: (0, 0)),    # g: resident, constant block
                pl.BlockSpec((1, D), lambda i: (0, 0)),    # b: resident, constant block
            ],
            out_specs=pl.BlockSpec((tm, D), lambda i: (i, 0)),
        ),
        compiler_params=pltpu.CompilerParams(
            dimension_semantics=("parallel",),
            vmem_limit_bytes=vmem_limit,
        ),
        cost_estimate=cost,
    )(x2, g2, b2)

    if m_pad != M:
        out = out[:M]
    return out.reshape(orig_shape)


if __name__ == "__main__":
    # Small but lane-dense test shape: D a multiple of 128 so output stores are unmasked.
    B, N, D = 2, 8, 128

    key = jax.random.PRNGKey(0)
    kx, kg, kb = jax.random.split(key, 3)
    x = jax.random.normal(kx, (B, N, D), dtype=jnp.float32)

    # 1) Module-default init, mirroring nn.Parameter(torch.ones/zeros(1, 1, dim)).
    g0 = jnp.ones((1, 1, D), dtype=jnp.float32)
    b0 = jnp.zeros((1, 1, D), dtype=jnp.float32)
    out0 = jax.block_until_ready(affine(x, g0, b0))
    assert out0.shape == (B, N, D)
    assert jnp.allclose(out0, x * g0 + b0, atol=1e-6), "mismatch vs reference (default init)"

    # 2) Non-trivial ("trained") parameters to exercise the broadcast math.
    g1 = jax.random.normal(kg, (1, 1, D), dtype=jnp.float32)
    b1 = jax.random.normal(kb, (1, 1, D), dtype=jnp.float32)
    out1 = jax.block_until_ready(affine(x, g1, b1))
    assert jnp.allclose(out1, x * g1 + b1, atol=1e-6), "mismatch vs reference (random params)"

    print("KERNEL_OK")
</pallas_src>

<mosaic_0001>
module attributes {stable_mosaic.version = 11 : i64} {
  func.func @_affine_kernel(%arg0: i32, %arg1: memref<16x128xf32, #tpu.memory_space<vmem>>, %arg2: memref<1x128xf32, #tpu.memory_space<vmem>>, %arg3: memref<1x128xf32, #tpu.memory_space<vmem>>, %arg4: memref<16x128xf32, #tpu.memory_space<vmem>>) attributes {dimension_semantics = [#tpu.dimension_semantics<parallel>], iteration_bounds = array<i64: 1>, scalar_prefetch = 0 : i64, scratch_operands = 0 : i64, tpu.core_type = #tpu.core_type<tc>, window_params = [{transform_indices = @transform_0, window_bounds = array<i64: 16, 128>}, {pipeline_mode = #tpu.pipeline_mode<synchronous>, transform_indices = @transform_1, window_bounds = array<i64: 1, 128>}, {pipeline_mode = #tpu.pipeline_mode<synchronous>, transform_indices = @transform_2, window_bounds = array<i64: 1, 128>}, {transform_indices = @transform_3, window_bounds = array<i64: 16, 128>}]} {
    %c0 = arith.constant 0 : index
    %c0_0 = arith.constant 0 : index
    %0 = vector.load %arg1[%c0, %c0_0] : memref<16x128xf32, #tpu.memory_space<vmem>>, vector<16x128xf32>
    %c0_1 = arith.constant 0 : index
    %c0_2 = arith.constant 0 : index
    %1 = vector.load %arg2[%c0_1, %c0_2] : memref<1x128xf32, #tpu.memory_space<vmem>>, vector<1x128xf32>
    %2 = vector.broadcast %1 : vector<1x128xf32> to vector<16x128xf32>
    %3 = arith.mulf %0, %2 : vector<16x128xf32>
    %c0_3 = arith.constant 0 : index
    %c0_4 = arith.constant 0 : index
    %4 = vector.load %arg3[%c0_3, %c0_4] : memref<1x128xf32, #tpu.memory_space<vmem>>, vector<1x128xf32>
    %5 = vector.broadcast %4 : vector<1x128xf32> to vector<16x128xf32>
    %6 = arith.addf %3, %5 : vector<16x128xf32>
    %c0_5 = arith.constant 0 : index
    %c0_6 = arith.constant 0 : index
    %7 = vector.load %arg4[%c0_5, %c0_6] : memref<16x128xf32, #tpu.memory_space<vmem>>, vector<16x128xf32>
    tpu.vector_store %arg4[%c0_5, %c0_6], %6 {strides = array<i32>} : memref<16x128xf32, #tpu.memory_space<vmem>>, vector<16x128xf32>,
    return
  }
  func.func @transform_0(%arg0: i32) -> (i32, i32) {
    %c0_i32 = arith.constant 0 : i32
    %c0_i32_0 = arith.constant 0 : i32
    return %arg0, %c0_i32 : i32, i32
  }
  func.func @transform_1(%arg0: i32) -> (i32, i32) {
    %c0_i32 = arith.constant 0 : i32
    %c0_i32_0 = arith.constant 0 : i32
    %c0_i32_1 = arith.constant 0 : i32
    return %c0_i32, %c0_i32_0 : i32, i32
  }
  func.func @transform_2(%arg0: i32) -> (i32, i32) {
    %c0_i32 = arith.constant 0 : i32
    %c0_i32_0 = arith.constant 0 : i32
    %c0_i32_1 = arith.constant 0 : i32
    return %c0_i32, %c0_i32_0 : i32, i32
  }
  func.func @transform_3(%arg0: i32) -> (i32, i32) {
    %c0_i32 = arith.constant 0 : i32
    %c0_i32_0 = arith.constant 0 : i32
    return %arg0, %c0_i32 : i32, i32
  }
}

</mosaic_0001>

<bundles_post_ra>
// kernel: tpu_custom_call.1
= control target key start
LH: loop header
LB: loop body
LE: loop exit
PB: predicated region body
PF: predicated region fallthrough
CT: control target
= control target key end

     0   :  { %8 = vsyncpa [#allocation3], 0  ;;  %s209_s0 = inlined_call_operand.hbm [shape: f32[16,128], index: 0, kind: input, shape index: {}]   ;;  %s210_s1 = inlined_call_operand.hbm [shape: f32[1,128], index: 1, kind: input, shape index: {}]   ;;  %s211_s2 = inlined_call_operand.vmem [shape: f32[1,128], index: 2, kind: input, shape index: {}]   ;;  %s212_s3 = inlined_call_operand.hbm [shape: f32[16,128], index: 3, kind: output, shape index: {}]  }
   0x1   :  { %9 = vsyncpa [#allocation6], 0 }
   0x2   :  { %10 = vsyncpa [#allocation4], 0  ;;  %s15_s14 = sshll.u32 %s209_s0, 4  ;;  %s166_s15 = smov [#allocation2]   ;;  %s16_s14 = int_to_ptr.hbm [resolvable:$true] %s15_s14 }
   0x3   :  { %s17_s16 = sshll.u32 %s166_s15, 4  ;;  %s29_s19 = sshll.u32 %s210_s1, 4  ;;  %s18_s16 = int_to_ptr.vmem [resolvable:$true] %s17_s16  ;;  %s30_s19 = int_to_ptr.hbm [resolvable:$true] %s29_s19 }
   0x4   :  { %s167_s20 = smov 128   ;;  %s168_s21 = smov 8  }
   0x5   :  { %23 = dma.hbm_to_vmem [thread:$0]  %s16_s14, 256, %s18_s16, [#allocation3], %s167_s20, %s167_s20, %s168_s21  }
   0x6   :  { %s169_s22 = smov [#allocation5]  }
   0x7   :  { %s31_s23 = sshll.u32 %s169_s22, 4  ;;  %s32_s23 = int_to_ptr.vmem [resolvable:$true] %s31_s23 }
   0x8   :  { %34 = dma.hbm_to_vmem [thread:$0]  %s30_s19, 16, %s32_s23, [#allocation6]  }
   0x9   :  { %160 = dma.done.wait [#allocation3], 256  }
   0xa   :  { %161 = vsyncadd [#allocation3], 4294967040 }
   0xb   :  { %162 = dma.done.wait [#allocation6], 16  }
   0xc   :  { %163 = vsyncadd [#allocation6], 4294967280  ;;  %v45_v0 = vld [vmem:[#allocation2] sm:$0xff]  ;;  %v86_v1 = vld [vmem:[#allocation5] ss:$0 sm:$0xff]  ;;  %s170_s1 = smov [#allocation7]  }
   0xd   :  { %v87_v2 = vld [vmem:[%s211_s2] ss:$0 sm:$0xff]  ;;  %v46_v3 = vld [vmem:[#allocation2 + $0x8] sm:$0xff]  ;;  %v51_v4 = vmul.f32 %v86_v1, %v45_v0  ;;  %s65_s25 = sshll.u32 %s170_s1, 4  ;;  %s67_s28 = sshll.u32 %s212_s3, 4  ;;  %s66_s25 = int_to_ptr.vmem [resolvable:$true] %s65_s25  ;;  %s68_s28 = int_to_ptr.hbm [resolvable:$true] %s67_s28 }
   0xe   :  { %v52_v5 = vmul.f32 %v86_v1, %v46_v3 }
   0xf   :  { %v57_v6 = vadd.f32 %v87_v2, %v51_v4 }
  0x10   :  { %v58_v7 = vadd.f32 %v87_v2, %v52_v5 }
  0x11   :  { %59 = vst [vmem:[#allocation7] sm:$0xff] %v57_v6 }
  0x12   :  { %60 = vst [vmem:[#allocation7 + $0x8] sm:$0xff] %v58_v7 }
  0x13   :  { %73 = dma.vmem_to_hbm [thread:$0]  %s66_s25, 256, %s68_s28, [#allocation4], %s167_s20, %s167_s20, %s168_s21  }
  0x14   :  { %164 = dma.done.wait [#allocation4], 256  }
  0x15   :  { %165 = vsyncadd [#allocation4], 4294967040 }
  0x16   :  { %78 = vsyncpa [#allocation3], 1 }
  0x17   :  { %79 = vsyncpa [#allocation6], 1 }
  0x18   :  { %80 = vsyncpa [#allocation4], 1 }

</bundles_post_ra>
